<compile_context>
chip_gen: v7x
topology: tpu7x:2x2x1
jax: 0.10.0
libtpu: 0.0.40
codegen_flags: <defaults>
</compile_context>

<pallas_src>
import jax
import jax.numpy as jnp
from jax.experimental import pallas as pl
from jax.experimental.pallas import tpu as pltpu


def _round_up(n, m):
    return ((n + m - 1) // m) * m


def mlp_kernel(x_ref, w1_ref, w2_ref, b2_ref, w3_ref, b3_ref, o_ref):
    # x_ref : [8, TILE_B]   (rows 0..6 = features, row 7 = ones -> folds fc1 bias)
    # w1_ref: [64, 8]       = [fc1.weight | fc1.bias]
    # w2_ref: [32, 64], b2_ref: [32, 1]
    # w3_ref: [1, 32],  b3_ref: [1, 1] (SMEM scalar)
    x = x_ref[...]
    h1 = jnp.maximum(
        jnp.dot(w1_ref[...], x, preferred_element_type=jnp.float32), 0.0
    )  # [64, TILE_B]
    h2 = jnp.dot(w2_ref[...], h1, preferred_element_type=jnp.float32) + b2_ref[...]
    h2 = jnp.maximum(h2, 0.0)  # [32, TILE_B]
    h3 = jnp.dot(w3_ref[...], h2, preferred_element_type=jnp.float32) + b3_ref[0, 0]
    o_ref[...] = h3.astype(o_ref.dtype)  # [1, TILE_B] lane-dense store


def mlp_forward(x, params, *, max_tile_b=16384):
    """x: [B, 7] float32.  params in PyTorch layout:
       w1 [64, 7], b1 [64], w2 [32, 64], b2 [32], w3 [1, 32], b3 [1]."""
    w1, b1, w2, b2, w3, b3 = params
    B = x.shape[0]

    # Tile the batch: large tiles amortize the ~0.35 us per-step overhead,
    # small demo batches just round up to one 128-lane tile.
    TILE_B = min(max_tile_b, _round_up(B, 128))
    Bp = _round_up(B, TILE_B)
    grid = (Bp // TILE_B,)

    # Transpose to lane-dense layout: batch on the 128-lane axis. Row 7 = ones.
    x_t = jnp.zeros((8, Bp), jnp.float32)
    x_t = x_t.at[:7, :B].set(x.T.astype(jnp.float32))
    x_t = x_t.at[7, :].set(1.0)

    w1_aug = jnp.concatenate(
        [w1.astype(jnp.float32), b1.astype(jnp.float32)[:, None]], axis=1
    )  # [64, 8]
    w2_f = w2.astype(jnp.float32)                      # [32, 64]
    b2_col = b2.astype(jnp.float32)[:, None]           # [32, 1]
    w3_f = w3.astype(jnp.float32)                      # [1, 32]
    b3_s = b3.astype(jnp.float32).reshape(1, 1)        # [1, 1] -> SMEM

    out_t = pl.pallas_call(
        mlp_kernel,
        out_shape=jax.ShapeDtypeStruct((1, Bp), jnp.float32),
        grid=grid,
        in_specs=[
            pl.BlockSpec((8, TILE_B), lambda i: (0, i)),   # x tile (pipelined)
            pl.BlockSpec((64, 8), lambda i: (0, 0)),       # weights: constant
            pl.BlockSpec((32, 64), lambda i: (0, 0)),      #   index_maps ->
            pl.BlockSpec((32, 1), lambda i: (0, 0)),       #   VMEM-resident
            pl.BlockSpec((1, 32), lambda i: (0, 0)),
            pl.BlockSpec(memory_space=pltpu.MemorySpace.SMEM),  # b3 scalar
        ],
        out_specs=pl.BlockSpec((1, TILE_B), lambda i: (0, i)),
        compiler_params=pltpu.CompilerParams(
            dimension_semantics=("parallel",),
        ),
    )(x_t, w1_aug, w2_f, b2_col, w3_f, b3_s)

    return out_t[:, :B].T  # [B, 1]


def init_params(key):
    # Mirrors nn.Linear default init: U(-1/sqrt(fan_in), +1/sqrt(fan_in)),
    # stored in PyTorch layout (weight [out, in], bias [out]).
    def linear(key, fan_in, fan_out):
        kw, kb = jax.random.split(key)
        bound = 1.0 / jnp.sqrt(float(fan_in))
        w = jax.random.uniform(kw, (fan_out, fan_in), jnp.float32, -bound, bound)
        b = jax.random.uniform(kb, (fan_out,), jnp.float32, -bound, bound)
        return w, b

    k1, k2, k3 = jax.random.split(key, 3)
    w1, b1 = linear(k1, 7, 64)
    w2, b2 = linear(k2, 64, 32)
    w3, b3 = linear(k3, 32, 1)
    return (w1, b1, w2, b2, w3, b3)


if __name__ == "__main__":
    key = jax.random.PRNGKey(0)
    kx, kp = jax.random.split(key)

    B = 10  # small, non-multiple-of-128 batch to exercise padding/slicing
    x = jax.random.normal(kx, (B, 7), jnp.float32)
    params = init_params(kp)

    out = mlp_forward(x, params)
    out = jax.block_until_ready(out)

    # Reference in plain JAX (PyTorch-layout math, highest precision).
    w1, b1, w2, b2, w3, b3 = params
    hp = jax.lax.Precision.HIGHEST
    ref = jnp.maximum(jnp.dot(x, w1.T, precision=hp) + b1, 0.0)
    ref = jnp.maximum(jnp.dot(ref, w2.T, precision=hp) + b2, 0.0)
    ref = jnp.dot(ref, w3.T, precision=hp) + b3

    assert out.shape == (B, 1)
    assert jnp.allclose(out, ref, atol=1e-4, rtol=1e-4)

    print("KERNEL_OK")
</pallas_src>

<mosaic_0001>
module attributes {stable_mosaic.version = 11 : i64} {
  func.func @mlp_kernel(%arg0: i32, %arg1: memref<8x128xf32, #tpu.memory_space<vmem>>, %arg2: memref<64x8xf32, #tpu.memory_space<vmem>>, %arg3: memref<32x64xf32, #tpu.memory_space<vmem>>, %arg4: memref<32x1xf32, #tpu.memory_space<vmem>>, %arg5: memref<1x32xf32, #tpu.memory_space<vmem>>, %arg6: memref<1x1xf32, #tpu.memory_space<smem>>, %arg7: memref<1x128xf32, #tpu.memory_space<vmem>>) attributes {dimension_semantics = [#tpu.dimension_semantics<parallel>], iteration_bounds = array<i64: 1>, scalar_prefetch = 0 : i64, scratch_operands = 0 : i64, tpu.core_type = #tpu.core_type<tc>, window_params = [{transform_indices = @transform_0, window_bounds = array<i64: 8, 128>}, {pipeline_mode = #tpu.pipeline_mode<synchronous>, transform_indices = @transform_1, window_bounds = array<i64: 64, 8>}, {pipeline_mode = #tpu.pipeline_mode<synchronous>, transform_indices = @transform_2, window_bounds = array<i64: 32, 64>}, {pipeline_mode = #tpu.pipeline_mode<synchronous>, transform_indices = @transform_3, window_bounds = array<i64: 32, 1>}, {pipeline_mode = #tpu.pipeline_mode<synchronous>, transform_indices = @transform_4, window_bounds = array<i64: 1, 32>}, {transform_indices = @transform_5, window_bounds = array<i64: 1, 1>}, {transform_indices = @transform_6, window_bounds = array<i64: 1, 128>}]} {
    %c0 = arith.constant 0 : index
    %c0_0 = arith.constant 0 : index
    %0 = vector.load %arg1[%c0, %c0_0] : memref<8x128xf32, #tpu.memory_space<vmem>>, vector<8x128xf32>
    %c0_1 = arith.constant 0 : index
    %c0_2 = arith.constant 0 : index
    %1 = vector.load %arg2[%c0_1, %c0_2] : memref<64x8xf32, #tpu.memory_space<vmem>>, vector<64x8xf32>
    %cst = arith.constant dense<0.000000e+00> : vector<64x128xf32>
    %2 = tpu.matmul %1, %0, %cst {dimension_numbers = #tpu.dot_dimension_numbers<[1], [0], [0], [1], [0, 0, 1, 1], [], []>} : vector<64x8xf32>, vector<8x128xf32>, vector<64x128xf32> -> vector<64x128xf32>
    %cst_3 = arith.constant 0.000000e+00 : f32
    %3 = vector.broadcast %cst_3 : f32 to vector<64x128xf32>
    %4 = arith.maximumf %2, %3 : vector<64x128xf32>
    %c0_4 = arith.constant 0 : index
    %c0_5 = arith.constant 0 : index
    %5 = vector.load %arg3[%c0_4, %c0_5] : memref<32x64xf32, #tpu.memory_space<vmem>>, vector<32x64xf32>
    %cst_6 = arith.constant dense<0.000000e+00> : vector<32x128xf32>
    %6 = tpu.matmul %5, %4, %cst_6 {dimension_numbers = #tpu.dot_dimension_numbers<[1], [0], [0], [1], [0, 0, 1, 1], [], []>} : vector<32x64xf32>, vector<64x128xf32>, vector<32x128xf32> -> vector<32x128xf32>
    %c0_7 = arith.constant 0 : index
    %c0_8 = arith.constant 0 : index
    %7 = vector.load %arg4[%c0_7, %c0_8] : memref<32x1xf32, #tpu.memory_space<vmem>>, vector<32x1xf32>
    %8 = vector.broadcast %7 : vector<32x1xf32> to vector<32x128xf32>
    %9 = arith.addf %6, %8 : vector<32x128xf32>
    %cst_9 = arith.constant 0.000000e+00 : f32
    %10 = vector.broadcast %cst_9 : f32 to vector<32x128xf32>
    %11 = arith.maximumf %9, %10 : vector<32x128xf32>
    %c0_10 = arith.constant 0 : index
    %c0_11 = arith.constant 0 : index
    %12 = vector.load %arg5[%c0_10, %c0_11] : memref<1x32xf32, #tpu.memory_space<vmem>>, vector<1x32xf32>
    %cst_12 = arith.constant dense<0.000000e+00> : vector<1x128xf32>
    %13 = tpu.matmul %12, %11, %cst_12 {dimension_numbers = #tpu.dot_dimension_numbers<[1], [0], [0], [1], [0, 0, 1, 1], [], []>} : vector<1x32xf32>, vector<32x128xf32>, vector<1x128xf32> -> vector<1x128xf32>
    %c0_13 = arith.constant 0 : index
    %c0_14 = arith.constant 0 : index
    %14 = memref.load %arg6[%c0_13, %c0_14] : memref<1x1xf32, #tpu.memory_space<smem>>
    %15 = vector.broadcast %14 : f32 to vector<1x128xf32>
    %16 = arith.addf %13, %15 : vector<1x128xf32>
    %c0_15 = arith.constant 0 : index
    %c0_16 = arith.constant 0 : index
    %17 = vector.load %arg7[%c0_15, %c0_16] : memref<1x128xf32, #tpu.memory_space<vmem>>, vector<1x128xf32>
    tpu.vector_store %arg7[%c0_15, %c0_16], %16 {strides = array<i32>} : memref<1x128xf32, #tpu.memory_space<vmem>>, vector<1x128xf32>,
    return
  }
  func.func @transform_0(%arg0: i32) -> (i32, i32) {
    %c0_i32 = arith.constant 0 : i32
    %c0_i32_0 = arith.constant 0 : i32
    return %c0_i32, %arg0 : i32, i32
  }
  func.func @transform_1(%arg0: i32) -> (i32, i32) {
    %c0_i32 = arith.constant 0 : i32
    %c0_i32_0 = arith.constant 0 : i32
    %c0_i32_1 = arith.constant 0 : i32
    return %c0_i32, %c0_i32_0 : i32, i32
  }
  func.func @transform_2(%arg0: i32) -> (i32, i32) {
    %c0_i32 = arith.constant 0 : i32
    %c0_i32_0 = arith.constant 0 : i32
    %c0_i32_1 = arith.constant 0 : i32
    return %c0_i32, %c0_i32_0 : i32, i32
  }
  func.func @transform_3(%arg0: i32) -> (i32, i32) {
    %c0_i32 = arith.constant 0 : i32
    %c0_i32_0 = arith.constant 0 : i32
    %c0_i32_1 = arith.constant 0 : i32
    return %c0_i32, %c0_i32_0 : i32, i32
  }
  func.func @transform_4(%arg0: i32) -> (i32, i32) {
    %c0_i32 = arith.constant 0 : i32
    %c0_i32_0 = arith.constant 0 : i32
    %c0_i32_1 = arith.constant 0 : i32
    return %c0_i32, %c0_i32_0 : i32, i32
  }
  func.func @transform_5(%arg0: i32) -> (i32, i32) {
    %c0_i32 = arith.constant 0 : i32
    %c0_i32_0 = arith.constant 0 : i32
    %c0_i32_1 = arith.constant 0 : i32
    return %c0_i32, %c0_i32_0 : i32, i32
  }
  func.func @transform_6(%arg0: i32) -> (i32, i32) {
    %c0_i32 = arith.constant 0 : i32
    %c0_i32_0 = arith.constant 0 : i32
    return %c0_i32, %arg0 : i32, i32
  }
}

</mosaic_0001>

<bundles_post_ra>
// kernel: tpu_custom_call.1
= control target key start
LH: loop header
LB: loop body
LE: loop exit
PB: predicated region body
PF: predicated region fallthrough
CT: control target
= control target key end

     0   :  { %vm34_vm0 = vcmask 64512   ;;  %s654_s0 = inlined_call_operand.vmem [shape: f32[8,128], index: 0, kind: input, shape index: {}]   ;;  %s655_s1 = inlined_call_operand.vmem [shape: f32[64,8], index: 1, kind: input, shape index: {}]   ;;  %s656_s2 = inlined_call_operand.vmem [shape: f32[32,64], index: 2, kind: input, shape index: {}]   ;;  %s657_s3 = inlined_call_operand.vmem [shape: f32[32,1], index: 3, kind: input, shape index: {}]   ;;  %s658_s4 = inlined_call_operand.vmem [shape: f32[1,32], index: 4, kind: input, shape index: {}]   ;;  %s659_s5 = inlined_call_operand.<no memory space> [shape: f32[1,1], index: 5, kind: input, shape index: {}]   ;;  %s660_s6 = inlined_call_operand.hbm [shape: f32[1,128], index: 6, kind: output, shape index: {}]  }
   0x1   :  { %v25_v0 = vld [vmem:[%s654_s0] sm:$0xff]  ;;  %v27_v2 = vld [vmem:[%s655_s1 + $0x8] sm:$0xff]  ;;  %v28_v3 = vld [vmem:[%s655_s1 + $0x10] sm:$0xff] }
   0x2   :  { %v26_v1 = vld [vmem:[%s655_s1] sm:$0xff]  ;;  %433 = vmatprep.subr.mxu0 %v25_v0 }
   0x3   :  { %435 = vmatprep.mubr.msk.f32.mxu0 %vm34_vm0, %v26_v1  ;;  %434 = vmatpush3.msra.mxu0 %v25_v0 }
   0x4   :  { %436 = vmatmul.mubr.msk.f32.vlgmr.msra.gmra.mrb[0].mxu0 %vm34_vm0, %v27_v2 }
   0x5   :  { %12 = vsyncpa [#allocation4], 0  ;;  %438 = vmatprep.mubr.msk.f32.mxu0 %vm34_vm0, %v28_v3  ;;  %v29_v4 = vld [vmem:[%s655_s1 + $0x18] sm:$0xff]  ;;  %v30_v5 = vld [vmem:[%s655_s1 + $0x20] sm:$0xff]  ;;  %vm200_vm1 = vcmask 523264   ;;  %v533_v12 = vmov 0   ;;  %v304_v59 = vstv %s659_s5 }
   0x6   :  { %v31_v6 = vld [vmem:[%s655_s1 + $0x28] sm:$0xff]  ;;  %v32_v7 = vld [vmem:[%s655_s1 + $0x30] sm:$0xff]  ;;  %v33_v8 = vld [vmem:[%s655_s1 + $0x38] sm:$0xff]  ;;  %507 = vset.pattern.permute.xlu0 %v533_v12  ;;  %508 = vset.pattern.permute.xlu1 %v533_v12  ;;  %v534_v38 = vmov 0.0|0.0   ;;  %vm535_vm2 = vmmov 0   ;;  %v536_v39 = vmov 0.0  }
   0x7   :  { %v172_v9 = vld [vmem:[%s656_s2] sm:$0xff]  ;;  %v178_v11 = vld [vmem:[%s657_s3 + $0x10] sm:$0xff]  ;;  %v177_v13 = vld [vmem:[%s657_s3 + $0x8] sm:$0xff]  ;;  %496 = vmatprep.subr.bf16.mxu0 %v534_v38  ;;  %vm305_vm3 = vcmask 261120   ;;  %s537_s30 = smov [#allocation3]  }
   0x8   :  { %439 = vmatmul.mubr.msk.f32.gmra.mrb[2].mxu0 %vm34_vm0, %v29_v4  ;;  %463 = vmatprep.mubr.msk.f32.mxu1 %vm200_vm1, %v172_v9  ;;  %v176_v10 = vld [vmem:[%s657_s3] sm:$0xff]  ;;  %v179_v14 = vld [vmem:[%s657_s3 + $0x18] sm:$0xff]  ;;  %v173_v35 = vld [vmem:[%s656_s2 + $0x8] sm:$0xff]  ;;  %s386_s7 = sshll.u32 %s537_s30, 4  ;;  %s387_s7 = int_to_ptr.vmem [resolvable:$true] %s386_s7 }
   0x9   :  { %441 = vmatprep.mubr.msk.f32.mxu0 %vm34_vm0, %v30_v5  ;;  %182 = vperm.xlu0 %507, %v176_v10   ;;  %v174_v36 = vld [vmem:[%s656_s2 + $0x10] sm:$0xff]  ;;  %v175_v37 = vld [vmem:[%s656_s2 + $0x18] sm:$0xff]  ;;  %v302_v58 = vld [vmem:[%s658_s4] sm:$0x1]  ;;  %s509_s8 = scalar_lea.vmem %s387_s7, 16  ;;  %s513_s9 = scalar_lea.vmem %s387_s7, 32 }
   0xa   :  { %192 = vperm.xlu1 %508, %v178_v11   ;;  %p510_p0 = scmp.ne.s32.totalorder %s387_s7, %s509_s8  ;;  %p514_p1 = scmp.lt.s32.totalorder %s387_s7, %s387_s7 }
   0xb   :  { %p515_p2 = scmp.lt.s32.totalorder %s513_s9, %s509_s8 }
   0xc   :  { %442 = vmatmul.mubr.msk.f32.gmra.mrb[4].mxu0 %vm34_vm0, %v31_v6 }
   0xd   :  { %444 = vmatprep.mubr.msk.f32.mxu0 %vm34_vm0, %v32_v7  ;;  %187 = vperm.xlu0 %507, %v177_v13   ;;  %p516_p3 = por %p515_p2, %p514_p1 }
   0xe   :  { %197 = vperm.xlu1 %508, %v179_v14  }
   0xf   :  { %p517_p4 = pnand %p516_p3, %p510_p0 }
  0x10   :  { %445 = vmatmul.mubr.msk.f32.gmra.mrb[6].mxu0 %vm34_vm0, %v33_v8 }
  0x11   :  { %477 = vmatprep.mubr.msk.f32.mxu0 %vm535_vm2, %v536_v39 }
  0x88   :  { %v183_v40 = vpop.permute.xlu0 %182 }
  0x89   :  { %v193_v41 = vpop.permute.xlu1 %192 }
  0x8c   :  { %v188_v42 = vpop.permute.xlu0 %187 }
  0x8d   :  { %v198_v50 = vpop.permute.xlu1 %197 }
  0xd7   :  { %v437_v15 = vpop.f32.mrb[0].mxu0 }
  0xd8   :  { %v165_v16 = vmax.f32 %v437_v15, 0.0  ;;  %v125_v17 = vpop.f32.mrb[1].mxu0 }
  0xd9   :  { %v164_v18 = vmax.f32 %v125_v17, 0.0 }
  0xdb   :  { %v440_v19 = vpop.f32.mrb[2].mxu0  ;;  %v480_v20 = vpack.c.bf16 %v165_v16, %v164_v18 }
  0xdc   :  { %v167_v21 = vmax.f32 %v440_v19, 0.0  ;;  %v135_v22 = vpop.f32.mrb[3].mxu0 }
  0xdd   :  { %v166_v23 = vmax.f32 %v135_v22, 0.0  ;;  %481 = vmatprep.subr.bf16.mxu1 %v480_v20 }
  0xde   :  { %483 = vmatpush3.bf16.msra.mxu1 %v480_v20 }
  0xdf   :  { %v484_v24 = vpack.c.bf16 %v167_v21, %v166_v23  ;;  %v443_v25 = vpop.f32.mrb[4].mxu0 }
  0xe0   :  { %v169_v26 = vmax.f32 %v443_v25, 0.0  ;;  %v145_v27 = vpop.f32.mrb[5].mxu0 }
  0xe1   :  { %v168_v28 = vmax.f32 %v145_v27, 0.0  ;;  %485 = vmatprep.subr.bf16.mxu1 %v484_v24 }
  0xe2   :  { %487 = vmatpush3.bf16.msra.mxu1 %v484_v24 }
  0xe3   :  { %v488_v29 = vpack.c.bf16 %v169_v26, %v168_v28  ;;  %v446_v30 = vpop.f32.mrb[6].mxu0 }
  0xe4   :  { %v171_v31 = vmax.f32 %v446_v30, 0.0  ;;  %v155_v32 = vpop.f32.mrb[7].mxu0 }
  0xe5   :  { %v170_v33 = vmax.f32 %v155_v32, 0.0  ;;  %489 = vmatprep.subr.bf16.mxu1 %v488_v29 }
  0xe6   :  { %491 = vmatpush3.bf16.msra.mxu1 %v488_v29 }
  0xe7   :  { %v492_v34 = vpack.c.bf16 %v171_v31, %v170_v33 }
  0xe9   :  { %493 = vmatprep.subr.bf16.mxu1 %v492_v34 }
  0xea   :  { %495 = vmatpush3.bf16.msra.mxu1 %v492_v34 }
  0xed   :  { %464 = vmatmul.mubr.msk.f32.vlgmr.msra.gmra.mrb[0].mxu1 %vm200_vm1, %v173_v35 }
  0xee   :  { %466 = vmatprep.mubr.msk.f32.mxu1 %vm200_vm1, %v174_v36 }
  0xf1   :  { %467 = vmatmul.mubr.msk.f32.gmra.mrb[2].mxu1 %vm200_vm1, %v175_v37 }
 0x1c0   :  { %v465_v43 = vpop.f32.mrb[0].mxu1 }
 0x1c1   :  { %v285_v44 = vadd.f32 %v465_v43, %v188_v42  ;;  %v279_v45 = vpop.f32.mrb[1].mxu1 }
 0x1c2   :  { %v280_v46 = vadd.f32 %v279_v45, %v183_v40 }
 0x1c3   :  { %v299_v47 = vmax.f32 %v285_v44, 0.0 }
 0x1c4   :  { %v298_v48 = vmax.f32 %v280_v46, 0.0  ;;  %v468_v49 = vpop.f32.mrb[2].mxu1 }
 0x1c5   :  { %v295_v51 = vadd.f32 %v468_v49, %v198_v50  ;;  %v289_v52 = vpop.f32.mrb[3].mxu1 }
 0x1c6   :  { %v497_v53 = vpack.c.bf16 %v299_v47, %v298_v48  ;;  %v290_v54 = vadd.f32 %v289_v52, %v193_v41 }
 0x1c7   :  { %v301_v55 = vmax.f32 %v295_v51, 0.0 }
 0x1c8   :  { %v300_v56 = vmax.f32 %v290_v54, 0.0  ;;  %498 = vmatpush3.bf16.msra.mxu0 %v497_v53 }
 0x1c9   :  { %499 = vmatprep.subr.bf16.mxu0 %v534_v38 }
 0x1ca   :  { %v500_v57 = vpack.c.bf16 %v301_v55, %v300_v56 }
 0x1cc   :  { %501 = vmatpush3.bf16.msra.mxu0 %v500_v57 }
 0x1cf   :  { %478 = vmatmul.mubr.msk.f32.vlgmr.msra.gmra.mrb[8].mxu0 %vm305_vm3, %v302_v58 }
 0x2a2   :  { %v375_v60 = vpop.f32.mrb[8].mxu0 }
 0x2a3   :  { %v376_v61 = vadd.f32 %v375_v60, %v304_v59  ;;  %v479_v62 = vpop.f32.mrb[9].mxu0 }
 0x2a5   :  { %379 = vst [vmem:[#allocation3] sm:$0x1] %v376_v61 }
 0x2a6   :  { %520 = shalt.err (!%p517_p4)
}
 0x2a7   :  { %s521_s11 = scalar_lea.hbm %s660_s6, 16 }
 0x2a8   :  { %p522_p5 = scmp.ne.s32.totalorder %s660_s6, %s521_s11  ;;  %p525_p6 = scmp.lt.u32.totalorder %s521_s11, %s660_s6 }
 0x2aa   :  { %p527_p7 = pnand %p525_p6, %p522_p5 }
 0x2ac   :  { %530 = shalt.err (!%p527_p7)
}
 0x2ad   :  { %389 = dma.vmem_to_hbm [thread:$0]  %s387_s7, 16, %s660_s6, [#allocation4]  }
 0x2ae   :  { %531 = dma.done.wait [#allocation4], 16  }
 0x2af   :  { %532 = vsyncadd [#allocation4], 4294967280 }
 0x2b0   :  { %393 = vsyncpa [#allocation4], 1 }

</bundles_post_ra>
